<compile_context>
chip_gen: v5e
topology: v5e:2x2
jax: 0.10.0
libtpu: 0.0.40
codegen_flags: <defaults>
</compile_context>

<pallas_src>
import functools
import math

import jax
import jax.numpy as jnp
from jax.experimental import pallas as pl
from jax.experimental.pallas import tpu as pltpu

_LANE = 128
_SUBLANE = 8


def _cdiv(a, b):
    return -(-a // b)


def _device_kind():
    try:
        return jax.devices()[0].device_kind.lower()
    except Exception:
        return ""


def _vmem_capacity_bytes():
    try:
        cap = int(pltpu.get_tpu_info().vmem_capacity_bytes)
        if cap > 0:
            return cap
    except Exception:
        pass
    return 64 * 1024 * 1024  # conservative fallback (v7x per-TC VMEM)


def _recon_loss_kernel(sr_ref, hr_ref, out_ref, acc_ref, *, loss_type,
                       tiles_per_core, tile_rows, rows_valid, inv_n, need_mask):
    c = pl.program_id(0)   # core-split axis
    i = pl.program_id(1)   # streaming / reduction axis ("arbitrary")

    @pl.when(i == 0)
    def _init():
        acc_ref[...] = jnp.zeros_like(acc_ref)

    def _tile_values():
        # Cast in-kernel: inputs stay in native dtype in HBM (halves the read
        # bytes for bf16/fp16 inputs).
        d = sr_ref[...].astype(jnp.float32) - hr_ref[...].astype(jnp.float32)
        return jnp.abs(d) if loss_type == "l1" else d * d

    def _fold(v):
        # (tile_rows,128) -> (tile_rows//8, 8, 128) is vreg-exact (layout-free);
        # the axis-0 sum is a chain of VPU vadds into a single-vreg accumulator.
        acc_ref[...] += v.reshape(-1, _SUBLANE, _LANE).sum(axis=0)

    if need_mask:
        row_base = (c * tiles_per_core + i) * tile_rows

        @pl.when(row_base + tile_rows <= rows_valid)
        def _full_tile():          # hot path: no iota / compare / select
            _fold(_tile_values())

        @pl.when(jnp.logical_and(row_base < rows_valid,
                                 row_base + tile_rows > rows_valid))
        def _ragged_tile():        # at most one tile per core
            v = _tile_values()
            row_ids = row_base + jax.lax.broadcasted_iota(jnp.int32, v.shape, 0)
            _fold(jnp.where(row_ids < rows_valid, v, 0.0))
        # Fully out-of-range tiles (row_base >= rows_valid, produced by the
        # clamped index_map) fall through both branches and are skipped.
    else:
        _fold(_tile_values())

    @pl.when(i == tiles_per_core - 1)
    def _finalize():
        # Single cross-lane reduce (XLU) + scale, once per core.
        out_ref[...] = (jnp.sum(acc_ref[...]) * inv_n).reshape(1, 1, 1)


def reconstruction_loss(sr, hr, loss_type="l1", *, tile_rows=None,
                        num_cores=None, min_kernel_elems=65536):
    """Mean L1 / L2 loss between sr and hr (nn.L1Loss / nn.MSELoss semantics)."""
    if loss_type not in ("l1", "l2"):
        raise SystemExit("Error: no such type of ReconstructionLoss!")
    assert sr.shape == hr.shape, "sr and hr must have the same shape"

    n_elems = int(math.prod(sr.shape))

    # ---- Tiny-input fast path: launch + pipeline setup would dominate. ------
    if n_elems < max(int(min_kernel_elems), 1):
        d = sr.astype(jnp.float32) - hr.astype(jnp.float32)
        return jnp.mean(jnp.abs(d)) if loss_type == "l1" else jnp.mean(d * d)

    kind = _device_kind()
    is_v7 = ("v7" in kind) or ("7x" in kind)
    if num_cores is None:
        num_cores = 2 if is_v7 else 1        # v5e/v6e have a single TensorCore
    if tile_rows is None:
        tile_rows = 8192 if is_v7 else 2048  # v6e plateaus ~1-2K rows; v7x HBM ~2.3x faster

    # ---- Lane-aligned (rows, 128) view of the flattened inputs. -------------
    rows = max(_cdiv(n_elems, _LANE), _SUBLANE)
    padded = rows * _LANE
    sr_flat = jnp.reshape(sr, (-1,))
    hr_flat = jnp.reshape(hr, (-1,))
    if padded != n_elems:
        # Tail zeros contribute 0 to both losses; we still divide by n_elems.
        # TODO(synk): for huge non-lane-aligned inputs this pad costs an extra
        # HBM round trip; a manual-DMA ragged tail would avoid it.
        sr_flat = jnp.pad(sr_flat, (0, padded - n_elems))
        hr_flat = jnp.pad(hr_flat, (0, padded - n_elems))
    sr2d = sr_flat.reshape(rows, _LANE)
    hr2d = hr_flat.reshape(rows, _LANE)

    # ---- Tile sizing: big tiles amortize ~0.35us/step; clamp to VMEM. -------
    in_bytes = jnp.dtype(sr.dtype).itemsize + jnp.dtype(hr.dtype).itemsize
    vmem_cap = _vmem_capacity_bytes()
    # 2 pipeline buffers per input must stay under ~half of VMEM capacity.
    max_tile_rows = max(_SUBLANE, (vmem_cap // 2) // (_LANE * 2 * in_bytes))
    tile_rows = int(min(max(int(tile_rows), _SUBLANE), rows, max_tile_rows))
    if tile_rows >= 32:
        tile_rows -= tile_rows % 32          # bf16 / int8 sublane packing
    else:
        tile_rows -= tile_rows % _SUBLANE    # keep the (8, 128) constraint
    tile_rows = max(tile_rows, _SUBLANE)
    tiles_total = _cdiv(rows, tile_rows)

    # ---- Optional TensorCore split (v7x); harmless size-1 axis elsewhere. ---
    num_cores = max(1, int(num_cores))
    num_cores = min(num_cores, tiles_total)
    tiles_per_core = _cdiv(tiles_total, num_cores)
    clamped = num_cores * tiles_per_core > tiles_total

    need_mask = (rows % tile_rows != 0) or clamped
    last_tile = tiles_total - 1
    if clamped:
        # Clamp so DMAs of out-of-range tiles stay in bounds; their compute is
        # skipped in-kernel.
        def in_map(c, i):
            return (jnp.minimum(c * tiles_per_core + i, last_tile), 0)
    else:
        def in_map(c, i):
            return (c * tiles_per_core + i, 0)

    kernel = functools.partial(
        _recon_loss_kernel,
        loss_type=loss_type,
        tiles_per_core=tiles_per_core,
        tile_rows=tile_rows,
        rows_valid=rows,
        inv_n=1.0 / float(n_elems),
        need_mask=need_mask,
    )

    # VMEM: 2 pipeline buffers per input + one 4 KiB f32 accumulator vreg.
    vmem_est = tile_rows * _LANE * 2 * in_bytes + _SUBLANE * _LANE * 4
    cost = pl.CostEstimate(
        flops=3 * n_elems,
        transcendentals=0,
        bytes_accessed=n_elems * in_bytes + 4 * num_cores,
    )

    def _call(dim_sems):
        cp_kwargs = dict(dimension_semantics=dim_sems)
        if vmem_est > 12 * 1024 * 1024:
            # Raise the scoped VMEM limit only when big tiles need it; stay
            # under the physical capacity of the current generation.
            cp_kwargs["vmem_limit_bytes"] = int(
                min(vmem_est + (8 << 20), int(vmem_cap * 0.9)))
        return pl.pallas_call(
            kernel,
            out_shape=jax.ShapeDtypeStruct((num_cores, 1, 1), jnp.float32),
            grid_spec=pltpu.PrefetchScalarGridSpec(
                num_scalar_prefetch=0,
                grid=(num_cores, tiles_per_core),
                in_specs=[
                    pl.BlockSpec((tile_rows, _LANE), in_map),
                    pl.BlockSpec((tile_rows, _LANE), in_map),
                ],
                out_specs=pl.BlockSpec((1, 1, 1), lambda c, i: (c, 0, 0)),
                scratch_shapes=[pltpu.VMEM((_SUBLANE, _LANE), jnp.float32)],
            ),
            compiler_params=pltpu.CompilerParams(**cp_kwargs),
            cost_estimate=cost,
        )(sr2d, hr2d)

    # Core-axis semantics: CORE_PARALLEL shards the leading axis across the two
    # TensorCores of a v7x chip; generic "parallel" otherwise. The fallback is
    # best-effort (eager only) in case a build rejects CORE_PARALLEL.
    if num_cores > 1:
        candidates = []
        if is_v7:
            candidates.append((pltpu.CORE_PARALLEL, pltpu.ARBITRARY))
        candidates.append((pltpu.PARALLEL, pltpu.ARBITRARY))
    else:
        candidates = [(pltpu.ARBITRARY, pltpu.ARBITRARY)]

    partials = None
    err = None
    for sems in candidates:
        try:
            partials = _call(sems)
            break
        except Exception as e:  # only hit if a build rejects CORE_PARALLEL
            err = e
    if partials is None:
        raise err

    # Combine per-core partial means (tiny op; one element per core).
    return jnp.sum(partials)


if __name__ == "__main__":
    key = jax.random.PRNGKey(0)
    k1, k2, k3, k4, k5, k6 = jax.random.split(key, 6)

    # Small NCHW shapes consistent with the super-resolution setting.
    sr = jax.random.normal(k1, (2, 4, 16, 16), dtype=jnp.float32)
    hr = jax.random.normal(k2, (2, 4, 16, 16), dtype=jnp.float32)
    ref_l1 = jnp.mean(jnp.abs(sr - hr))
    ref_l2 = jnp.mean((sr - hr) ** 2)

    # Default call: tiny input takes the fused-XLA fast path.
    out_l1 = jax.block_until_ready(reconstruction_loss(sr, hr, "l1"))
    out_l2 = jax.block_until_ready(reconstruction_loss(sr, hr, "l2"))
    assert jnp.allclose(out_l1, ref_l1, rtol=1e-5, atol=1e-6)
    assert jnp.allclose(out_l2, ref_l2, rtol=1e-5, atol=1e-6)

    # Force the Pallas kernel on the same small shape (single-tile path).
    k_l1 = jax.block_until_ready(
        reconstruction_loss(sr, hr, "l1", min_kernel_elems=0))
    k_l2 = jax.block_until_ready(
        reconstruction_loss(sr, hr, "l2", min_kernel_elems=0))
    assert jnp.allclose(k_l1, ref_l1, rtol=1e-5, atol=1e-6)
    assert jnp.allclose(k_l2, ref_l2, rtol=1e-5, atol=1e-6)

    # Multi-tile streaming with a ragged last tile plus an explicit 2-way core
    # split (exercises the clamped index_map + straddling-tile mask).
    sr2 = jax.random.normal(k3, (2, 3, 40, 48), dtype=jnp.float32)
    hr2 = jax.random.normal(k4, (2, 3, 40, 48), dtype=jnp.float32)
    got2 = jax.block_until_ready(
        reconstruction_loss(sr2, hr2, "l1", tile_rows=32, num_cores=2,
                            min_kernel_elems=0))
    ref2 = jnp.mean(jnp.abs(sr2 - hr2))
    assert jnp.allclose(got2, ref2, rtol=1e-5, atol=1e-6)

    # Larger bf16 case takes the default kernel path (in-kernel f32 cast).
    sr3 = jax.random.normal(k5, (2, 8, 128, 128), jnp.float32).astype(jnp.bfloat16)
    hr3 = jax.random.normal(k6, (2, 8, 128, 128), jnp.float32).astype(jnp.bfloat16)
    got3 = jax.block_until_ready(reconstruction_loss(sr3, hr3, "l2"))
    ref3 = jnp.mean((sr3.astype(jnp.float32) - hr3.astype(jnp.float32)) ** 2)
    assert jnp.allclose(got3, ref3, rtol=1e-4, atol=1e-5)

    print("KERNEL_OK")
</pallas_src>

<mosaic_0001>
module attributes {stable_mosaic.version = 11 : i64} {
  func.func @_recon_loss_kernel(%arg0: i32, %arg1: i32, %arg2: memref<16x128xf32, #tpu.memory_space<vmem>>, %arg3: memref<16x128xf32, #tpu.memory_space<vmem>>, %arg4: memref<1x1x1xf32, #tpu.memory_space<vmem>>, %arg5: memref<8x128xf32, #tpu.memory_space<vmem>>) attributes {dimension_semantics = [#tpu.dimension_semantics<arbitrary>, #tpu.dimension_semantics<arbitrary>], iteration_bounds = array<i64: 1, 1>, scalar_prefetch = 0 : i64, scratch_operands = 1 : i64, tpu.core_type = #tpu.core_type<tc>, window_params = [{transform_indices = @transform_0, window_bounds = array<i64: 16, 128>}, {transform_indices = @transform_1, window_bounds = array<i64: 16, 128>}, {transform_indices = @transform_2, window_bounds = array<i64: 1, 1, 1>}]} {
    %c0_i32 = arith.constant 0 : i32
    %0 = arith.cmpi eq, %arg1, %c0_i32 : i32
    %1 = arith.extui %0 : i1 to i32
    %c0_i32_0 = arith.constant 0 : i32
    %2 = arith.cmpi ne, %1, %c0_i32_0 : i32
    scf.if %2 {
      %cst_10 = arith.constant 0.000000e+00 : f32
      %15 = vector.broadcast %cst_10 : f32 to vector<8x128xf32>
      %c0_11 = arith.constant 0 : index
      %c0_12 = arith.constant 0 : index
      %16 = vector.load %arg5[%c0_11, %c0_12] : memref<8x128xf32, #tpu.memory_space<vmem>>, vector<8x128xf32>
      tpu.vector_store %arg5[%c0_11, %c0_12], %15 {strides = array<i32>} : memref<8x128xf32, #tpu.memory_space<vmem>>, vector<8x128xf32>,
    } else {
    }
    %c0 = arith.constant 0 : index
    %c0_1 = arith.constant 0 : index
    %3 = vector.load %arg2[%c0, %c0_1] : memref<16x128xf32, #tpu.memory_space<vmem>>, vector<16x128xf32>
    %c0_2 = arith.constant 0 : index
    %c0_3 = arith.constant 0 : index
    %4 = vector.load %arg3[%c0_2, %c0_3] : memref<16x128xf32, #tpu.memory_space<vmem>>, vector<16x128xf32>
    %5 = arith.subf %3, %4 : vector<16x128xf32>
    %6 = math.absf %5 : vector<16x128xf32>
    %c0_4 = arith.constant 0 : index
    %c0_5 = arith.constant 0 : index
    %7 = vector.load %arg5[%c0_4, %c0_5] : memref<8x128xf32, #tpu.memory_space<vmem>>, vector<8x128xf32>
    %8 = vector.shape_cast %6 : vector<16x128xf32> to vector<2x8x128xf32>
    %cst = arith.constant dense<0.000000e+00> : vector<8x128xf32>
    %9 = vector.multi_reduction <add>, %8, %cst [0] : vector<2x8x128xf32> to vector<8x128xf32>
    %10 = arith.addf %7, %9 : vector<8x128xf32>
    %c0_6 = arith.constant 0 : index
    %c0_7 = arith.constant 0 : index
    %11 = vector.load %arg5[%c0_6, %c0_7] : memref<8x128xf32, #tpu.memory_space<vmem>>, vector<8x128xf32>
    tpu.vector_store %arg5[%c0_6, %c0_7], %10 {strides = array<i32>} : memref<8x128xf32, #tpu.memory_space<vmem>>, vector<8x128xf32>,
    %c0_i32_8 = arith.constant 0 : i32
    %12 = arith.cmpi eq, %arg1, %c0_i32_8 : i32
    %13 = arith.extui %12 : i1 to i32
    %c0_i32_9 = arith.constant 0 : i32
    %14 = arith.cmpi ne, %13, %c0_i32_9 : i32
    scf.if %14 {
      %c0_10 = arith.constant 0 : index
      %c0_11 = arith.constant 0 : index
      %15 = vector.load %arg5[%c0_10, %c0_11] : memref<8x128xf32, #tpu.memory_space<vmem>>, vector<8x128xf32>
      %16 = vector.shape_cast %15 : vector<8x128xf32> to vector<1x8x128xf32>
      %cst_12 = arith.constant dense<0.000000e+00> : vector<1xf32>
      %17 = vector.multi_reduction <add>, %16, %cst_12 [1, 2] : vector<1x8x128xf32> to vector<1xf32>
      %18 = vector.shape_cast %17 : vector<1xf32> to vector<1x1x1xf32>
      %19 = vector.extract %18[0, 0, 0] : f32 from vector<1x1x1xf32>
      %cst_13 = arith.constant 4.8828125E-4 : f32
      %20 = arith.mulf %19, %cst_13 : f32
      %21 = vector.broadcast %20 : f32 to vector<1x1x1xf32>
      %c0_14 = arith.constant 0 : index
      %c0_15 = arith.constant 0 : index
      %c0_16 = arith.constant 0 : index
      %22 = vector.load %arg4[%c0_14, %c0_15, %c0_16] : memref<1x1x1xf32, #tpu.memory_space<vmem>>, vector<1x1x1xf32>
      tpu.vector_store %arg4[%c0_14, %c0_15, %c0_16], %21 {strides = array<i32>} : memref<1x1x1xf32, #tpu.memory_space<vmem>>, vector<1x1x1xf32>,
    } else {
    }
    return
  }
  func.func @transform_0(%arg0: i32, %arg1: i32) -> (i32, i32) {
    %c1_i32 = arith.constant 1 : i32
    %0 = arith.muli %arg0, %c1_i32 : i32
    %1 = arith.addi %0, %arg1 : i32
    %c0_i32 = arith.constant 0 : i32
    %c0_i32_0 = arith.constant 0 : i32
    return %1, %c0_i32 : i32, i32
  }
  func.func @transform_1(%arg0: i32, %arg1: i32) -> (i32, i32) {
    %c1_i32 = arith.constant 1 : i32
    %0 = arith.muli %arg0, %c1_i32 : i32
    %1 = arith.addi %0, %arg1 : i32
    %c0_i32 = arith.constant 0 : i32
    %c0_i32_0 = arith.constant 0 : i32
    return %1, %c0_i32 : i32, i32
  }
  func.func @transform_2(%arg0: i32, %arg1: i32) -> (i32, i32, i32) {
    %c0_i32 = arith.constant 0 : i32
    %c0_i32_0 = arith.constant 0 : i32
    %c0_i32_1 = arith.constant 0 : i32
    return %arg0, %c0_i32, %c0_i32_0 : i32, i32, i32
  }
}

</mosaic_0001>

<bundles_post_ra>
// kernel: tpu_custom_call.1
= control target key start
LH: loop header
LB: loop body
LE: loop exit
PB: predicated region body
PF: predicated region fallthrough
CT: control target
= control target key end

     0   :  { %7 = vsyncpa [#allocation4], 0  ;;  %s222_s0 = inlined_call_operand.hbm [shape: f32[16,128], index: 0, kind: input, shape index: {}]   ;;  %s223_s1 = inlined_call_operand.hbm [shape: f32[16,128], index: 1, kind: input, shape index: {}]   ;;  %s224_s2 = inlined_call_operand.hbm [shape: f32[1,1,1], index: 2, kind: output, shape index: {}]  }
   0x1   :  { %8 = vsyncpa [#allocation7], 0 }
   0x2   :  { %9 = vsyncpa [#allocation5], 0  ;;  %s18_s11 = sshll.u32 %s222_s0, 4  ;;  %s193_s12 = smov [#allocation3]   ;;  %s19_s11 = int_to_ptr.hbm [resolvable:$true] %s18_s11 }
   0x3   :  { %s20_s13 = sshll.u32 %s193_s12, 4  ;;  %s35_s16 = sshll.u32 %s223_s1, 4  ;;  %s21_s13 = int_to_ptr.vmem [resolvable:$true] %s20_s13  ;;  %s36_s16 = int_to_ptr.hbm [resolvable:$true] %s35_s16 }
   0x4   :  { %s194_s17 = smov 128   ;;  %s195_s18 = smov 8  }
   0x5   :  { %26 = dma.hbm_to_vmem [thread:$0]  %s19_s11, 256, %s21_s13, [#allocation4], %s194_s17, %s194_s17, %s195_s18  }
   0x6   :  { %s196_s19 = smov [#allocation6]  }
   0x7   :  { %s37_s20 = sshll.u32 %s196_s19, 4  ;;  %s38_s20 = int_to_ptr.vmem [resolvable:$true] %s37_s20 }
   0x8   :  { %43 = dma.hbm_to_vmem [thread:$0]  %s36_s16, 256, %s38_s20, [#allocation7], %s194_s17, %s194_s17, %s195_s18  }
   0x9   :  { %187 = dma.done.wait [#allocation4], 256  }
   0xa   :  { %188 = vsyncadd [#allocation4], 4294967040 }
   0xb   :  { %189 = dma.done.wait [#allocation7], 256  }
   0xc   :  { %190 = vsyncadd [#allocation7], 4294967040  ;;  %v61_v0 = vld [vmem:[#allocation3] sm:$0xff]  ;;  %v62_v1 = vld [vmem:[#allocation3 + $0x8] sm:$0xff]  ;;  %s197_s0 = smov [#allocation8]   ;;  %s97_s23 = sshll.u32 %s224_s2, 4  ;;  %s98_s23 = int_to_ptr.hbm [resolvable:$true] %s97_s23 }
   0xd   :  { %v63_v2 = vld [vmem:[#allocation6] sm:$0xff]  ;;  %v64_v3 = vld [vmem:[#allocation6 + $0x8] sm:$0xff]  ;;  %s95_s1 = sshll.u32 %s197_s0, 4  ;;  %vm88_vm0 = vcmask 0   ;;  %s96_s1 = int_to_ptr.vmem [resolvable:$true] %s95_s1 }
   0xe   :  { %v65_v4 = vsub.f32 %v61_v0, %v63_v2  ;;  %v66_v5 = vsub.f32 %v62_v1, %v64_v3 }
  0x10   :  { %v67_v6 = vand.u32 2147483647, %v65_v4  ;;  %v68_v7 = vand.u32 2147483647, %v66_v5 }
  0x12   :  { %v70_v8 = vadd.f32 %v68_v7, %v67_v6 }
  0x14   :  { %77 = vadd.xlane.f32.xlu0 %v70_v8 }
  0x87   :  { %v78_v9 = vpop.xlane.xlu0 %77 }
  0x88   :  { %v79_v10 = vrot.slane %v78_v9, 4 }
  0x8a   :  { %v80_v11 = vadd.f32 %v79_v10, %v78_v9 }
  0x8c   :  { %v81_v12 = vrot.slane %v80_v11, 2 }
  0x8e   :  { %v82_v13 = vadd.f32 %v81_v12, %v80_v11 }
  0x90   :  { %v83_v14 = vrot.slane %v82_v13, 1 }
  0x92   :  { %v84_v15 = vadd.f32 %v83_v14, %v82_v13 }
  0x94   :  { %108 = vpush %v84_v15 }
  0xc5   :  { %s109_s24 = spop %108 }
  0xc6   :  { %s86_s25 = smul.f32 0.00048828125, %s109_s24 }
  0xc8   :  { %v87_v16 = vstv %s86_s25 }
  0xc9   :  { %89 = vst.msk [vmem:[#allocation8] sm:$0x1] %vm88_vm0, %v87_v16 }
  0xca   :  { %100 = dma.vmem_to_hbm [thread:$0]  %s96_s1, 16, %s98_s23, [#allocation5]  }
  0xcb   :  { %191 = dma.done.wait [#allocation5], 16  }
  0xcc   :  { %192 = vsyncadd [#allocation5], 4294967280 }
  0xcd   :  { %105 = vsyncpa [#allocation4], 1 }
  0xce   :  { %106 = vsyncpa [#allocation7], 1 }
  0xcf   :  { %107 = vsyncpa [#allocation5], 1 }

</bundles_post_ra>
